<compile_context>
chip_gen: v6e
topology: v6e:2x2x1
jax: 0.10.0
libtpu: 0.0.40
codegen_flags: <defaults>
</compile_context>

<pallas_src>
import functools

import jax
import jax.numpy as jnp
from jax import lax
from jax.experimental import pallas as pl
from jax.experimental.pallas import tpu as pltpu


def _round_up(x, m):
    return ((x + m - 1) // m) * m


def _flash_sdpa_kernel(q_ref, k_ref, v_ref, o_ref, m_sc, l_sc, acc_sc,
                       *, scale, lk_valid, block_k, needs_mask):
    # q_ref: (tq, Dp), k_ref: (tk, Dp), v_ref: (tk, Dvp), o_ref: (tq, Dvp)
    ki = pl.program_id(2)

    @pl.when(ki == 0)
    def _():
        m_sc[...] = jnp.full_like(m_sc, -jnp.inf)
        l_sc[...] = jnp.zeros_like(l_sc)
        acc_sc[...] = jnp.zeros_like(acc_sc)

    q = q_ref[...]
    if scale is not None:
        # Fold the scale into Q (Lq*D VPU multiplies vs Lq*Lk on the scores).
        q = q * jnp.asarray(scale, dtype=q.dtype)

    # s = Q @ K^T without materializing a transposed K tile: contract last dims.
    s = lax.dot_general(
        q, k_ref[...],
        dimension_numbers=(((1,), (1,)), ((), ())),
        preferred_element_type=jnp.float32)

    if needs_mask:
        # Mask zero-padded key columns (only compiled in when Lk was padded).
        col = ki * block_k + lax.broadcasted_iota(jnp.int32, s.shape, 1)
        s = jnp.where(col < lk_valid, s, -1e30)

    # Online softmax (f32 math on all generations; only MXU operands are low-prec).
    m_prev = m_sc[...]
    m_new = jnp.maximum(m_prev, jnp.max(s, axis=-1, keepdims=True))
    alpha = jnp.exp(m_prev - m_new)
    p = jnp.exp(s - m_new)
    l_sc[...] = alpha * l_sc[...] + jnp.sum(p, axis=-1, keepdims=True)
    acc_sc[...] = alpha * acc_sc[...] + lax.dot_general(
        p.astype(v_ref.dtype), v_ref[...],
        dimension_numbers=(((1,), (0,)), ((), ())),
        preferred_element_type=jnp.float32)
    m_sc[...] = m_new

    @pl.when(ki == pl.num_programs(2) - 1)
    def _():
        l = l_sc[...]
        inv = pl.reciprocal(l, approx=True)   # EUP vrcp (free slot)
        inv = inv * (2.0 - l * inv)           # one Newton step -> ~f32 precision
        o_ref[...] = (acc_sc[...] * inv).astype(o_ref.dtype)


def scaled_dot_product_attention(Q, K, V, scale=None, *,
                                 block_q=512, block_k=512,
                                 vmem_limit_bytes=48 * 1024 * 1024):
    """Pallas flash-attention implementation of Scaled_Dot_Product_Attention.forward."""
    B, Lq, D = Q.shape
    Bk, Lk, Dk = K.shape
    Bv, Lkv, Dv = V.shape
    assert D == Dk and Bk == B and Bv == B and Lkv == Lk

    # Mirror PyTorch `if scale:` — skip scaling when scale is None or 0.
    scale = float(scale) if scale else None

    # Lane-dense padding (last dim -> multiple of 128); sublane dims -> mult of 8.
    d_pad = _round_up(D, 128)
    dv_pad = _round_up(Dv, 128)
    tq = min(block_q, _round_up(Lq, 8))
    tk = min(block_k, _round_up(Lk, 8))
    lq_pad = _round_up(Lq, tq)
    lk_pad = _round_up(Lk, tk)

    qp = jnp.pad(Q, ((0, 0), (0, lq_pad - Lq), (0, d_pad - D)))
    kp = jnp.pad(K, ((0, 0), (0, lk_pad - Lk), (0, d_pad - D)))
    vp = jnp.pad(V, ((0, 0), (0, lk_pad - Lk), (0, dv_pad - Dv)))

    grid = (B, lq_pad // tq, lk_pad // tk)

    kernel = functools.partial(
        _flash_sdpa_kernel,
        scale=scale, lk_valid=Lk, block_k=tk, needs_mask=(lk_pad != Lk))

    itemsize = jnp.dtype(Q.dtype).itemsize
    cost = pl.CostEstimate(
        flops=2 * B * lq_pad * lk_pad * (d_pad + dv_pad),
        transcendentals=B * lq_pad * lk_pad,
        bytes_accessed=(qp.size + kp.size + vp.size + B * lq_pad * dv_pad) * itemsize)

    out = pl.pallas_call(
        kernel,
        out_shape=jax.ShapeDtypeStruct((B, lq_pad, dv_pad), Q.dtype),
        grid_spec=pltpu.PrefetchScalarGridSpec(
            num_scalar_prefetch=0,
            grid=grid,
            in_specs=[
                pl.BlockSpec((pl.Squeezed(), tq, d_pad),
                             lambda b, qi, ki: (b, qi, 0)),
                pl.BlockSpec((pl.Squeezed(), tk, d_pad),
                             lambda b, qi, ki: (b, ki, 0)),
                pl.BlockSpec((pl.Squeezed(), tk, dv_pad),
                             lambda b, qi, ki: (b, ki, 0)),
            ],
            out_specs=pl.BlockSpec((pl.Squeezed(), tq, dv_pad),
                                   lambda b, qi, ki: (b, qi, 0)),
            scratch_shapes=[
                pltpu.VMEM((tq, 1), jnp.float32),       # running max m
                pltpu.VMEM((tq, 1), jnp.float32),       # running sum l
                pltpu.VMEM((tq, dv_pad), jnp.float32),  # output accumulator
            ],
        ),
        compiler_params=pltpu.CompilerParams(
            dimension_semantics=("parallel", "parallel", "arbitrary"),
            vmem_limit_bytes=vmem_limit_bytes,
        ),
        cost_estimate=cost,
    )(qp, kp, vp)

    return out[:, :Lq, :Dv]


def _reference_sdpa(Q, K, V, scale=None):
    # Pure-JAX reference mirroring the PyTorch forward exactly (incl. `if scale:`).
    attention = jnp.einsum("bqd,bkd->bqk", Q, K)
    if scale:
        attention = attention * scale
    attention = jax.nn.softmax(attention, axis=-1)
    return jnp.einsum("bqk,bkd->bqd", attention, V)


if __name__ == "__main__":
    key = jax.random.PRNGKey(0)
    kq, kk, kv = jax.random.split(key, 3)

    # Small shapes consistent with Multi_Head_Attention in the module:
    # dim_model=340, num_head=5 -> dim_head=68; batch*heads and seq kept small.
    B, Lq, Lk, D, Dv = 2, 24, 24, 68, 68
    Q = jax.random.normal(kq, (B, Lq, D), dtype=jnp.float32)
    K = jax.random.normal(kk, (B, Lk, D), dtype=jnp.float32)
    V = jax.random.normal(kv, (B, Lk, Dv), dtype=jnp.float32)
    scale = D ** -0.5

    # Force small blocks to exercise the multi-tile online-softmax + key-mask path.
    out = scaled_dot_product_attention(Q, K, V, scale=scale, block_q=8, block_k=16)
    out = jax.block_until_ready(out)
    ref = _reference_sdpa(Q, K, V, scale=scale)
    assert out.shape == (B, Lq, Dv)
    assert jnp.allclose(out, ref, atol=1e-4, rtol=1e-4), float(jnp.max(jnp.abs(out - ref)))

    # Default single-tile path and the scale=None branch (PyTorch default).
    out_ns = jax.block_until_ready(scaled_dot_product_attention(Q, K, V))
    ref_ns = _reference_sdpa(Q, K, V)
    assert jnp.allclose(out_ns, ref_ns, atol=1e-4, rtol=1e-4)

    # bf16 inputs: matmul operands stay bf16 (full-rate MXU), softmax math in f32.
    Qb, Kb, Vb = (x.astype(jnp.bfloat16) for x in (Q, K, V))
    out_bf = jax.block_until_ready(
        scaled_dot_product_attention(Qb, Kb, Vb, scale=scale))
    assert out_bf.dtype == jnp.bfloat16
    assert jnp.allclose(out_bf.astype(jnp.float32),
                        _reference_sdpa(Q, K, V, scale=scale),
                        atol=5e-2, rtol=5e-2)

    print("KERNEL_OK")
</pallas_src>

<mosaic_0001>
module attributes {stable_mosaic.version = 11 : i64} {
  func.func @_flash_sdpa_kernel(%arg0: i32, %arg1: i32, %arg2: i32, %arg3: memref<1x8x128xf32, #tpu.memory_space<vmem>>, %arg4: memref<1x16x128xf32, #tpu.memory_space<vmem>>, %arg5: memref<1x16x128xf32, #tpu.memory_space<vmem>>, %arg6: memref<1x8x128xf32, #tpu.memory_space<vmem>>, %arg7: memref<8x1xf32, #tpu.memory_space<vmem>>, %arg8: memref<8x1xf32, #tpu.memory_space<vmem>>, %arg9: memref<8x128xf32, #tpu.memory_space<vmem>>) attributes {dimension_semantics = [#tpu.dimension_semantics<parallel>, #tpu.dimension_semantics<parallel>, #tpu.dimension_semantics<arbitrary>], iteration_bounds = array<i64: 2, 3, 2>, scalar_prefetch = 0 : i64, scratch_operands = 3 : i64, tpu.core_type = #tpu.core_type<tc>, window_params = [{transform_indices = @transform_0, window_bounds = array<i64: 1, 8, 128>}, {transform_indices = @transform_1, window_bounds = array<i64: 1, 16, 128>}, {transform_indices = @transform_2, window_bounds = array<i64: 1, 16, 128>}, {transform_indices = @transform_3, window_bounds = array<i64: 1, 8, 128>}]} {
    %c0_i32 = arith.constant 0 : i32
    %0 = arith.cmpi eq, %arg2, %c0_i32 : i32
    %1 = arith.extui %0 : i1 to i32
    %c0_i32_0 = arith.constant 0 : i32
    %2 = arith.cmpi ne, %1, %c0_i32_0 : i32
    scf.if %2 {
      %cst_27 = arith.constant 0xFF800000 : f32
      %45 = vector.broadcast %cst_27 : f32 to vector<8x1xf32>
      %c0_28 = arith.constant 0 : index
      %c0_29 = arith.constant 0 : index
      %46 = vector.load %arg7[%c0_28, %c0_29] : memref<8x1xf32, #tpu.memory_space<vmem>>, vector<8x1xf32>
      tpu.vector_store %arg7[%c0_28, %c0_29], %45 {strides = array<i32>} : memref<8x1xf32, #tpu.memory_space<vmem>>, vector<8x1xf32>,
      %cst_30 = arith.constant 0.000000e+00 : f32
      %47 = vector.broadcast %cst_30 : f32 to vector<8x1xf32>
      %c0_31 = arith.constant 0 : index
      %c0_32 = arith.constant 0 : index
      %48 = vector.load %arg8[%c0_31, %c0_32] : memref<8x1xf32, #tpu.memory_space<vmem>>, vector<8x1xf32>
      tpu.vector_store %arg8[%c0_31, %c0_32], %47 {strides = array<i32>} : memref<8x1xf32, #tpu.memory_space<vmem>>, vector<8x1xf32>,
      %cst_33 = arith.constant 0.000000e+00 : f32
      %49 = vector.broadcast %cst_33 : f32 to vector<8x128xf32>
      %c0_34 = arith.constant 0 : index
      %c0_35 = arith.constant 0 : index
      %50 = vector.load %arg9[%c0_34, %c0_35] : memref<8x128xf32, #tpu.memory_space<vmem>>, vector<8x128xf32>
      tpu.vector_store %arg9[%c0_34, %c0_35], %49 {strides = array<i32>} : memref<8x128xf32, #tpu.memory_space<vmem>>, vector<8x128xf32>,
    } else {
    }
    %c0 = arith.constant 0 : index
    %c0_1 = arith.constant 0 : index
    %c0_2 = arith.constant 0 : index
    %3 = vector.load %arg3[%c0, %c0_1, %c0_2] : memref<1x8x128xf32, #tpu.memory_space<vmem>>, vector<1x8x128xf32>
    %4 = vector.shape_cast %3 : vector<1x8x128xf32> to vector<8x128xf32>
    %cst = arith.constant 0.12126781 : f32
    %5 = vector.broadcast %cst : f32 to vector<8x128xf32>
    %6 = arith.mulf %4, %5 : vector<8x128xf32>
    %c0_3 = arith.constant 0 : index
    %c0_4 = arith.constant 0 : index
    %c0_5 = arith.constant 0 : index
    %7 = vector.load %arg4[%c0_3, %c0_4, %c0_5] : memref<1x16x128xf32, #tpu.memory_space<vmem>>, vector<1x16x128xf32>
    %8 = vector.shape_cast %7 : vector<1x16x128xf32> to vector<16x128xf32>
    %cst_6 = arith.constant dense<0.000000e+00> : vector<8x16xf32>
    %9 = tpu.matmul %6, %8, %cst_6 {dimension_numbers = #tpu.dot_dimension_numbers<[1], [1], [0], [0], [0, 0, 1, 0], [], []>} : vector<8x128xf32>, vector<16x128xf32>, vector<8x16xf32> -> vector<8x16xf32>
    %c16_i32 = arith.constant 16 : i32
    %10 = arith.muli %arg2, %c16_i32 : i32
    %11 = tpu.iota {dimensions = array<i32: 1>} : vector<8x16xi32>
    %12 = vector.broadcast %10 : i32 to vector<8x16xi32>
    %13 = arith.addi %12, %11 : vector<8x16xi32>
    %c24_i32 = arith.constant 24 : i32
    %14 = vector.broadcast %c24_i32 : i32 to vector<8x16xi32>
    %15 = arith.cmpi slt, %13, %14 : vector<8x16xi32>
    %cst_7 = arith.constant -1.000000e+30 : f32
    %16 = vector.broadcast %cst_7 : f32 to vector<8x16xf32>
    %17 = arith.select %15, %9, %16 : vector<8x16xi1>, vector<8x16xf32>
    %c0_8 = arith.constant 0 : index
    %c0_9 = arith.constant 0 : index
    %18 = vector.load %arg7[%c0_8, %c0_9] : memref<8x1xf32, #tpu.memory_space<vmem>>, vector<8x1xf32>
    %cst_10 = arith.constant dense<0xFF800000> : vector<8xf32>
    %19 = vector.multi_reduction <maximumf>, %17, %cst_10 [1] : vector<8x16xf32> to vector<8xf32>
    %20 = vector.shape_cast %19 : vector<8xf32> to vector<8x1xf32>
    %21 = arith.maximumf %18, %20 : vector<8x1xf32>
    %22 = arith.subf %18, %21 : vector<8x1xf32>
    %23 = math.exp %22 : vector<8x1xf32>
    %24 = vector.broadcast %21 : vector<8x1xf32> to vector<8x16xf32>
    %25 = arith.subf %17, %24 : vector<8x16xf32>
    %26 = math.exp %25 : vector<8x16xf32>
    %c0_11 = arith.constant 0 : index
    %c0_12 = arith.constant 0 : index
    %27 = vector.load %arg8[%c0_11, %c0_12] : memref<8x1xf32, #tpu.memory_space<vmem>>, vector<8x1xf32>
    %28 = arith.mulf %23, %27 : vector<8x1xf32>
    %cst_13 = arith.constant dense<0.000000e+00> : vector<8xf32>
    %29 = vector.multi_reduction <add>, %26, %cst_13 [1] : vector<8x16xf32> to vector<8xf32>
    %30 = vector.shape_cast %29 : vector<8xf32> to vector<8x1xf32>
    %31 = arith.addf %28, %30 : vector<8x1xf32>
    %c0_14 = arith.constant 0 : index
    %c0_15 = arith.constant 0 : index
    %32 = vector.load %arg8[%c0_14, %c0_15] : memref<8x1xf32, #tpu.memory_space<vmem>>, vector<8x1xf32>
    tpu.vector_store %arg8[%c0_14, %c0_15], %31 {strides = array<i32>} : memref<8x1xf32, #tpu.memory_space<vmem>>, vector<8x1xf32>,
    %c0_16 = arith.constant 0 : index
    %c0_17 = arith.constant 0 : index
    %33 = vector.load %arg9[%c0_16, %c0_17] : memref<8x128xf32, #tpu.memory_space<vmem>>, vector<8x128xf32>
    %34 = vector.broadcast %23 : vector<8x1xf32> to vector<8x128xf32>
    %35 = arith.mulf %34, %33 : vector<8x128xf32>
    %c0_18 = arith.constant 0 : index
    %c0_19 = arith.constant 0 : index
    %c0_20 = arith.constant 0 : index
    %36 = vector.load %arg5[%c0_18, %c0_19, %c0_20] : memref<1x16x128xf32, #tpu.memory_space<vmem>>, vector<1x16x128xf32>
    %37 = vector.shape_cast %36 : vector<1x16x128xf32> to vector<16x128xf32>
    %cst_21 = arith.constant dense<0.000000e+00> : vector<8x128xf32>
    %38 = tpu.matmul %26, %37, %cst_21 {dimension_numbers = #tpu.dot_dimension_numbers<[1], [0], [0], [1], [0, 0, 1, 1], [], []>} : vector<8x16xf32>, vector<16x128xf32>, vector<8x128xf32> -> vector<8x128xf32>
    %39 = arith.addf %35, %38 : vector<8x128xf32>
    %c0_22 = arith.constant 0 : index
    %c0_23 = arith.constant 0 : index
    %40 = vector.load %arg9[%c0_22, %c0_23] : memref<8x128xf32, #tpu.memory_space<vmem>>, vector<8x128xf32>
    tpu.vector_store %arg9[%c0_22, %c0_23], %39 {strides = array<i32>} : memref<8x128xf32, #tpu.memory_space<vmem>>, vector<8x128xf32>,
    %c0_24 = arith.constant 0 : index
    %c0_25 = arith.constant 0 : index
    %41 = vector.load %arg7[%c0_24, %c0_25] : memref<8x1xf32, #tpu.memory_space<vmem>>, vector<8x1xf32>
    tpu.vector_store %arg7[%c0_24, %c0_25], %21 {strides = array<i32>} : memref<8x1xf32, #tpu.memory_space<vmem>>, vector<8x1xf32>,
    %c1_i32 = arith.constant 1 : i32
    %42 = arith.cmpi eq, %arg2, %c1_i32 : i32
    %43 = arith.extui %42 : i1 to i32
    %c0_i32_26 = arith.constant 0 : i32
    %44 = arith.cmpi ne, %43, %c0_i32_26 : i32
    scf.if %44 {
      %c0_27 = arith.constant 0 : index
      %c0_28 = arith.constant 0 : index
      %45 = vector.load %arg8[%c0_27, %c0_28] : memref<8x1xf32, #tpu.memory_space<vmem>>, vector<8x1xf32>
      %46 = tpu.reciprocal %45 {approx = true} : vector<8x1xf32> -> vector<8x1xf32>
      %47 = arith.mulf %45, %46 : vector<8x1xf32>
      %cst_29 = arith.constant 2.000000e+00 : f32
      %48 = vector.broadcast %cst_29 : f32 to vector<8x1xf32>
      %49 = arith.subf %48, %47 : vector<8x1xf32>
      %50 = arith.mulf %46, %49 : vector<8x1xf32>
      %c0_30 = arith.constant 0 : index
      %c0_31 = arith.constant 0 : index
      %51 = vector.load %arg9[%c0_30, %c0_31] : memref<8x128xf32, #tpu.memory_space<vmem>>, vector<8x128xf32>
      %52 = vector.broadcast %50 : vector<8x1xf32> to vector<8x128xf32>
      %53 = arith.mulf %51, %52 : vector<8x128xf32>
      %c0_32 = arith.constant 0 : index
      %c0_33 = arith.constant 0 : index
      %c0_34 = arith.constant 0 : index
      %54 = vector.load %arg6[%c0_32, %c0_33, %c0_34] : memref<1x8x128xf32, #tpu.memory_space<vmem>>, vector<1x8x128xf32>
      %55 = vector.shape_cast %54 : vector<1x8x128xf32> to vector<8x128xf32>
      %56 = vector.shape_cast %53 : vector<8x128xf32> to vector<1x8x128xf32>
      tpu.vector_store %arg6[%c0_32, %c0_33, %c0_34], %56 {strides = array<i32>} : memref<1x8x128xf32, #tpu.memory_space<vmem>>, vector<1x8x128xf32>,
    } else {
    }
    return
  }
  func.func @transform_0(%arg0: i32, %arg1: i32, %arg2: i32) -> (i32, i32, i32) {
    %c0_i32 = arith.constant 0 : i32
    %c0_i32_0 = arith.constant 0 : i32
    return %arg0, %arg1, %c0_i32 : i32, i32, i32
  }
  func.func @transform_1(%arg0: i32, %arg1: i32, %arg2: i32) -> (i32, i32, i32) {
    %c0_i32 = arith.constant 0 : i32
    %c0_i32_0 = arith.constant 0 : i32
    return %arg0, %arg2, %c0_i32 : i32, i32, i32
  }
  func.func @transform_2(%arg0: i32, %arg1: i32, %arg2: i32) -> (i32, i32, i32) {
    %c0_i32 = arith.constant 0 : i32
    %c0_i32_0 = arith.constant 0 : i32
    return %arg0, %arg2, %c0_i32 : i32, i32, i32
  }
  func.func @transform_3(%arg0: i32, %arg1: i32, %arg2: i32) -> (i32, i32, i32) {
    %c0_i32 = arith.constant 0 : i32
    %c0_i32_0 = arith.constant 0 : i32
    return %arg0, %arg1, %c0_i32 : i32, i32, i32
  }
}

</mosaic_0001>

<bundles_post_ra>
// kernel: tpu_custom_call.1
= control target key start
LH: loop header
LB: loop body
LE: loop exit
PB: predicated region body
PF: predicated region fallthrough
CT: control target
= control target key end

     0   :  { %s1459_s0 = inlined_call_operand.hbm [shape: f32[2,24,128], index: 0, kind: input, shape index: {}]   ;;  %s1460_s1 = inlined_call_operand.hbm [shape: f32[2,32,128], index: 1, kind: input, shape index: {}]   ;;  %s1461_s2 = inlined_call_operand.hbm [shape: f32[2,32,128], index: 2, kind: input, shape index: {}]   ;;  %s1462_s3 = inlined_call_operand.hbm [shape: f32[2,24,128], index: 3, kind: output, shape index: {}]  }
   0x1   :  { %1483 = sst [smem:[#allocation28_spill]] %s1460_s1 }
   0x2   :  { %1484 = sst [smem:[#allocation29_spill]] %s1461_s2 }
   0x3   :  { %1485 = sst [smem:[#allocation30_spill]] %s1462_s3 }
   0x4   :  { %8 = vsyncpa [#allocation6], 0 }
   0x5   :  { %10 = vsyncpa [#allocation6 + $0x1], 0 }
   0x6   :  { %11 = vsyncpa [#allocation9], 0 }
   0x7   :  { %13 = vsyncpa [#allocation9 + $0x1], 0 }
   0x8   :  { %14 = vsyncpa [#allocation7], 0 }
   0x9   :  { %16 = vsyncpa [#allocation7 + $0x1], 0  ;;  %s1122_s12 = smov 0   ;;  %s1124_s13 = smov 0  }
   0xa   :  { %s1126_s14 = smov 0   ;;  %s1128_s15 = smov 0  }
   0xb   :  { %s1130_s16 = smov 0   ;;  %s1132_s17 = smov 0  }
   0xc   :  { %s1134_s18 = smov 0   ;;  %s1136_s19 = smov 0  }
   0xd   :  { %s1138_s20 = smov 0   ;;  %s1140_s21 = smov 0  }
   0xe   :  { %s1142_s22 = smov 0   ;;  %s1144_s23 = smov 0  }
   0xf   :  { %s1146_s24 = smov 0  }
  0x10 LB: > { %1486 = sst [smem:[#allocation15_spill]] %s1044_s13  ;;  %s34_s25 = sadd.s32 1, %s1076_s21  ;;  %s1088_s24 = sphi %s1146_s24, %s22_s24   ;;  %s1084_s23 = sphi %s1144_s23, %s1536_s23   ;;  %s1080_s22 = sphi %s1142_s22, %s1543_s22   ;;  %s1076_s21 = sphi %s1140_s21, %s1534_s21   ;;  %s1072_s20 = sphi %s1138_s20, %s1533_s20   ;;  %s1068_s19 = sphi %s1136_s19, %s1542_s19   ;;  %s1064_s18 = sphi %s1134_s18, %s1532_s18   ;;  %s1060_s17 = sphi %s1132_s17, %s1541_s17   ;;  %s1056_s16 = sphi %s1130_s16, %s1540_s16   ;;  %s1052_s15 = sphi %s1128_s15, %s1539_s15   ;;  %s1048_s14 = sphi %s1126_s14, %s1538_s14   ;;  %s1044_s13 = sphi %s1124_s13, %s1537_s13   ;;  %s1040_s12 = sphi %s1122_s12, %s1531_s12  }
  0x11   : > { %1487 = sst [smem:[#allocation16_spill]] %s1064_s18  ;;  %p58_p0 = scmp.eq.s32.totalorder %s1088_s24, 0 }
  0x12   : > { %1488 = sst [smem:[#allocation17_spill]] %s1068_s19  ;;  %p1189_p1 = scmp.ge.s32.totalorder %s34_s25, 2 }
  0x13   : > { %1489 = sst [smem:[#allocation18_spill]] %s1072_s20  ;;  %p85_p2 = scmp.ne.s32.totalorder %s1048_s14, %s1044_s13 }
  0x14   : > { %1490 = sst [smem:[#allocation19_spill]] %s1076_s21  ;;  %p91_p3 = scmp.ne.s32.totalorder %s1044_s13, %s1040_s12 }
  0x15   : > { %1491 = sst [smem:[#allocation20_spill]] %s1084_s23  ;;  %s1545_s25 = smov (%p1189_p1, %s34_s25), 0 }
  0x16   : > { %1493 = sst [smem:[#allocation21_spill]] %s1545_s25  ;;  %p1204_p4 = por %p85_p2, %p58_p0 }
  0x17   : > { %p1468_p5 = scmp.lt.s32.totalorder %s1088_s24, 12  ;;  %s191_s30 = sand.u32 1, %s1088_s24  }
  0x18   : > { %s193_s4 = sand.u32 1, %s1048_s14   ;;  %s677_s6 = sshll.u32 %s1076_s21, 1 }
  0x19   : > { %s1213_s5 = sshll.u32 %s193_s4, 4  ;;  %s678_s7 = sshll.u32 %s1084_s23, 2 }
  0x1a   : > { %s195_s8 = scalar_lea.vmem [#allocation8], %s1213_s5  ;;  %s201_s10 = sadd.s32 %s678_s7, %s677_s6 }
  0x1b   : > { %s204_s9 = sshll.u32 %s195_s8, 4  ;;  %s679_s11 = sshll.u32 %s201_s10, 7  ;;  %s205_s9 = int_to_ptr.vmem [resolvable:$true] %s204_s9 }
  0x1c   : > { %p1222_p6 = pnand %p1468_p5, %p1204_p4  ;;  %s1496_s1 = sld [smem:[#allocation28_spill]] }
  0x1d   : > { %s1229_s19 = scalar_lea.sflag [#allocation9], %s191_s30  ;;  %s877_s8 = scalar_lea.vmem %s205_s9, 256 }
  0x1e   : > { %p1466_p7 = pneg %p1222_p6  ;;  %p878_p8 = scmp.ne.s32.totalorder %s205_s9, %s877_s8 }
  0x1f   : > { %s1090_s28 = smov [#allocation8]  }
  0x20   : > { %p880_p9 = pnand %p878_p8, %p1466_p7  ;;  %s882_s6 = sshll.u32 %s1090_s28, 4  ;;  %s883_s6 = int_to_ptr.vmem [resolvable:$false] %s882_s6 }
  0x21   : > { %s884_s7 = scalar_lea.vmem %s883_s6, 512  ;;  %p885_p11 = scmp.lt.s32.totalorder %s205_s9, %s883_s6 }
  0x22   : > { %s203_s4 = scalar_lea.hbm %s1496_s1, %s679_s11  ;;  %p881_p10 = pneg %p880_p9 }
  0x23   : > { %p886_p12 = scmp.lt.s32.totalorder %s884_s7, %s877_s8 }
  0x25   : > { %p887_p13 = por %p886_p12, %p885_p11 }
  0x27   : > { %p888_p2 = pnand %p887_p13, %p881_p10 }
  0x29   : > { %891 = shalt.err (!%p888_p2)
}
  0x2a   : > { %s1464_s3 = smov 128   ;;  %s1465_s29 = smov 8  }
  0x2b   : > { %733 = dma.hbm_to_vmem [thread:$0]  (!%p1222_p6), %s203_s4, 256, %s205_s9, %s1229_s19, %s1464_s3, %s1464_s3, %s1465_s29  }
  0x2c   : > { %s1497_s2 = sld [smem:[#allocation29_spill]]  ;;  %s218_s28 = scalar_lea.vmem [#allocation10], %s1213_s5 }
  0x2d   : > { %s227_s6 = sshll.u32 %s218_s28, 4  ;;  %p684_p4 = scmp.ge.s32.totalorder %s1088_s24, 1  ;;  %s1249_s6 = int_to_ptr.vmem [resolvable:$true] %s227_s6 }
  0x2e   : > { %p235_p8 = scmp.lt.s32.totalorder %s1088_s24, 13  ;;  %s1257_s9 = sadd.s32 4294967295, %s1088_s24  }
  0x2f   : > { %1499 = sst [smem:[#allocation22_spill]] %s1257_s9  ;;  %s671_s5 = sadd.s32 4294967294, %s1088_s24  }
  0x30   : > { %p1252_p9 = pnand %p684_p4, %p235_p8  ;;  %s41_s4 = sadd.s32 1, %s1084_s23 }
  0x31   : > { %s50_s30 = sadd.s32 1, %s1060_s17  ;;  %p57_p11 = scmp.ne.s32.totalorder %s1060_s17, %s1056_s16 }
  0x32   : > { %s1245_s8 = scalar_lea.hbm %s1497_s2, %s679_s11  ;;  %s37_s11 = sadd.s32 1, %s1080_s22 }
  0x33   : > { %s1547_s11 = smov (!%p1189_p1, %s37_s11), %s1080_s22  ;;  %p63_p12 = scmp.ne.s32.totalorder %s1056_s16, %s1052_s15 }
  0x34   : > { %p39_p10 = scmp.ge.s32.totalorder %s1547_s11, 3  ;;  %p64_p13 = scmp.eq.s32.totalorder %s1257_s9, 0 }
  0x35   : > { %p1278_p1 = por %p58_p0, %p57_p11  ;;  %p145_p0 = scmp.eq.s32.totalorder %s1257_s9, 11 }
  0x36   : > { %s1549_s11 = smov (%p39_p10, %s1547_s11), 0  ;;  %s1551_s4 = smov (!%p39_p10, %s41_s4), %s1084_s23 }
  0x37   : > { %1500 = sst [smem:[#allocation23_spill]] %s1549_s11  ;;  %s46_s10 = ssub.s32 %s1080_s22, %s1549_s11 }
  0x38   : > { %p43_p2 = scmp.ge.s32.totalorder %s1551_s4, 2  ;;  %p1285_p4 = por %p64_p13, %p63_p12 }
  0x39   : > { %p1292_p8 = por %p91_p3, %p64_p13  ;;  %p1299_p10 = por %p145_p0, %p57_p11 }
  0x3a   : > { %s1502_s28 = scalar_select %p1285_p4, 1, 0 }
  0x3b   : > { %s1504_s3 = scalar_select %p1292_p8, 1, 0 }
  0x3c   : > { %1503 = sst [smem:[#allocation24_spill]] %s1502_s28  ;;  %s1553_s4 = smov (%p43_p2, %s1551_s4), 0 }
  0x3d   : > { %1505 = sst [smem:[#allocation25_spill]] %s1504_s3  ;;  %p151_p7 = scmp.eq.s32.totalorder %s671_s5, 11 }
  0x3e   : > { %1506 = sst [smem:[#allocation26_spill]] %s1553_s4  ;;  %s45_s1 = ssub.s32 %s1084_s23, %s1553_s4 }
  0x3f   : > { %s1507_s29 = scalar_select %p1299_p10, 1, 0 }
  0x40   : > { %s171_s2 = sand.u32 1, %s1060_s17   ;;  %s47_s12 = sor.u32 %s46_s10, %s45_s1 }
  0x41   : > { %1508 = sst [smem:[#allocation27_spill]] %s1507_s29  ;;  %s1509_s11 = ssub.s32 %s1076_s21, %s1545_s25 }
  0x42   : > { %s75_s20 = sor.u32 %s1509_s11, %s45_s1  ;;  %p48_p3 = scmp.eq.s32.totalorder %s47_s12, 0 }
  0x43   : > { %p76_p13 = scmp.eq.s32.totalorder %s75_s20, 0  ;;  %p1312_p5 = por %p151_p7, %p63_p12 }
  0x44   : > { %s1317_s3 = scalar_select %p48_p3, %s1060_s17, %s50_s30  }
  0x45   : > { %s1510_s18 = scalar_select %p1312_p5, 1, 0 }
  0x46   : > { %s1511_s13 = sadd.s32 1, %s1048_s14  ;;  %s674_s28 = sshll.u32 %s171_s2, 3 }
  0x47   : > { %s1322_s9 = scalar_select %p76_p13, %s1048_s14, %s1511_s13  }
  0x48   : > { %s717_s29 = smul.u32 3, %s1084_s23  ;;  %p1512_p11 = scmp.lt.s32.totalorder %s1088_s24, 12 }
  0x49   : > { %s175_s20 = scalar_lea.vmem [#allocation5], %s674_s28  ;;  %s172_s13 = scalar_lea.sflag [#allocation6], %s171_s2 }
  0x4a   : > { %p1329_p2 = pnand %p1512_p11, %p1278_p1  ;;  %s180_s1 = sadd.s32 %s1080_s22, %s717_s29 }
  0x4b   : > { %s184_s11 = sshll.u32 %s175_s20, 4  ;;  %s675_s10 = sshll.u32 %s180_s1, 7  ;;  %s185_s11 = int_to_ptr.vmem [resolvable:$true] %s184_s11 }
  0x4c   : > { %s182_s4 = scalar_lea.hbm %s1459_s0, %s675_s10  ;;  %p894_p7 = pneg %p1329_p2 }
  0x4d   : > { %s905_s25 = scalar_lea.vmem %s185_s11, 128  ;;  %s1093_s26 = smov [#allocation5]  }
  0x4e   : > { %p906_p12 = scmp.ne.s32.totalorder %s185_s11, %s905_s25  ;;  %s910_s23 = sshll.u32 %s1093_s26, 4  ;;  %s911_s23 = int_to_ptr.vmem [resolvable:$false] %s910_s23 }
  0x4f   : > { %s912_s21 = scalar_lea.vmem %s911_s23, 256  ;;  %p913_p3 = scmp.lt.s32.totalorder %s185_s11, %s911_s23 }
  0x50   : > { %p908_p0 = pnand %p906_p12, %p894_p7  ;;  %p914_p13 = scmp.lt.s32.totalorder %s912_s21, %s905_s25 }
  0x52   : > { %p909_p1 = pneg %p908_p0  ;;  %p915_p11 = por %p914_p13, %p913_p3 }
  0x54   : > { %p916_p5 = pnand %p915_p11, %p909_p1 }
  0x56   : > { %919 = shalt.err (!%p916_p5)
}
  0x57   : > { %730 = dma.hbm_to_vmem [thread:$0]  (!%p1329_p2), %s182_s4, 128, %s185_s11, %s172_s13  }
  0x58   : > { %s933_s2 = scalar_lea.vmem %s1249_s6, 256  ;;  %p1514_p7 = pneg %p1222_p6 }
  0x59   : > { %p934_p10 = scmp.ne.s32.totalorder %s1249_s6, %s933_s2  ;;  %s1094_s29 = smov [#allocation10]  }
  0x5a   : > { %s938_s28 = sshll.u32 %s1094_s29, 4  ;;  %s939_s28 = int_to_ptr.vmem [resolvable:$false] %s938_s28 }
  0x5b   : > { %p936_p12 = pnand %p934_p10, %p1514_p7  ;;  %s940_s21 = scalar_lea.vmem %s939_s28, 512 }
  0x5c   : > { %p941_p3 = scmp.lt.s32.totalorder %s1249_s6, %s939_s28  ;;  %p942_p1 = scmp.lt.s32.totalorder %s940_s21, %s933_s2 }
  0x5d   : > { %p937_p0 = pneg %p936_p12 }
  0x5e   : > { %p943_p5 = por %p942_p1, %p941_p3 }
  0x60   : > { %p944_p13 = pnand %p943_p5, %p937_p0 }
  0x62   : > { %947 = shalt.err (!%p944_p13)
}
  0x63   : > { %s1515_s23 = smov 8   ;;  %s1516_s25 = smov 128  }
  0x64   : > { %736 = dma.hbm_to_vmem [thread:$0]  (!%p1222_p6), %s1245_s8, 256, %s1249_s6, %s1229_s19, %s1516_s25, %s1516_s25, %s1515_s23  }
  0x65   : > { %239 = sbr.rel (%p1252_p9) target bundleno = 993 (0x3e1), region = 32  ;;  %s1358_s5 = sand.u32 (!%p1252_p9), 1, %s1056_s16  }
  0x66   : > { %s685_s1 = sshll.u32 (!%p1252_p9), %s1358_s5, 3  ;;  %s242_s20 = scalar_lea.sflag (!%p1252_p9), [#allocation6], %s1358_s5 }
  0x67   : > { %s245_s11 = scalar_lea.vmem (!%p1252_p9), [#allocation5], %s685_s1 }
  0x6a   : > { %1027 = dma.done.wait (%p1285_p4), %s242_s20, 128  }
  0x6b   : > { %1029 = vsyncadd (%p1285_p4), %s242_s20, 4294967168  ;;  %s1518_s27 = sld [smem:[#allocation22_spill]] }
  0x6c   : > { %s1519_s10 = sld [smem:[#allocation15_spill]] }
  0x71   : > { %s250_s8 = sand.u32 1, %s1518_s27  }
  0x72   : > { %s252_s6 = sand.u32 1, %s1519_s10   ;;  %s251_s12 = scalar_lea.sflag [#allocation9], %s250_s8 }
  0x73   : > { %s1368_s7 = sshll.u32 %s252_s6, 4 }
  0x74   : > { %s254_s30 = scalar_lea.vmem [#allocation8], %s1368_s7 }
  0x75   : > { %1031 = dma.done.wait (%p1292_p8), %s251_s12, 512  }
  0x76   : > { %1033 = vsyncadd (%p1292_p8), %s251_s12, 4294966784  ;;  %s263_s13 = scalar_lea.vmem [#allocation10], %s1368_s7  ;;  %s1376_s26 = scalar_lea.vmem [#allocation11], %s685_s1 }
  0x77   : > { %s1521_s2 = sld [smem:[#allocation16_spill]] }
  0x7d   : > { %p689_p6 = scmp.ne.s32.totalorder %s1521_s2, 0 }
  0x7f   : > { %301 = sbr.rel (%p689_p6) target bundleno = 135 (0x87), region = 48 }
  0x84   : > { %vm302_vm0 = vcmask 7168   ;;  %v1095_v0 = vmov -inf   ;;  %v1096_v1 = vmov 0.0  }
  0x85   : > { %303 = vst.msk [vmem:[#allocation2] sm:$0xff] %vm302_vm0, %v1095_v0  ;;  %304 = vst.msk [vmem:[#allocation3] sm:$0xff] %vm302_vm0, %v1096_v1 }
  0x86   : > { %305 = vst [vmem:[#allocation4] sm:$0xff] %v1096_v1 }
  0x87 PF: > { %v309_v2 = vld [vmem:[%s254_s30 + $0x8] sm:$0xff]  ;;  %s1522_s29 = sld [smem:[#allocation16_spill]]  ;;  %v1097_v3 = vmov 0.0   ;;  %vm1098_vm1 = vmmov 0   ;;  %v308_v5 = vld [vmem:[%s254_s30] sm:$0xff]  ;;  %v381_v7 = vlaneseq  ;;  %vm388_vm3 = vcmask 130048  }
  0x88   : > { %703 = vmatprep.subr.mxu0 %v1097_v3  ;;  %707 = vmatprep.mubr.msk.f32.mxu0 %vm1098_vm1, %v1097_v3  ;;  %v306_v4 = vld [vmem:[%s245_s11] sm:$0xff]  ;;  %v1099_v15 = vmov 0   ;;  %vm410_vm4 = vcmask 7168   ;;  %v419_v21 = vld [vmem:[%s263_s13] sm:$0xff] }
  0x89   : > { %704 = vmatpush3.xpose.msra.mxu0 %v309_v2  ;;  %710 = vmatprep.subr.mxu1 %v1097_v3  ;;  %v307_v6 = vmul.f32 0.12126781, %v306_v4  ;;  %v382_v8 = vand.u32 127, %v381_v7  ;;  %v420_v20 = vld [vmem:[%s263_s13 + $0x8] sm:$0xff] }
  0x8a   : > { %705 = vmatprep.subr.mxu0 %v1097_v3  ;;  %714 = vmatprep.mubr.msk.f32.mxu1 %vm1098_vm1, %v1097_v3 }
  0x8b   : > { %855 = vset.pattern.permute.xlu0 %v1099_v15  ;;  %856 = vset.pattern.permute.xlu1 %v1099_v15 }
  0x8c   : > { %v387_v16 = vld [vmem:[#allocation2] sm:$0xff]  ;;  %711 = vmatpush3.msra.mxu1 %v420_v20  ;;  %v404_v29 = vld [vmem:[#allocation3] sm:$0xff] }
  0x8d   : > { %706 = vmatpush3.xpose.msra.mxu0 %v308_v5  ;;  %s690_s28 = sshll.u32 %s1522_s29, 4  ;;  %712 = vmatprep.subr.mxu1 %v1097_v3  ;;  %v412_v33 = vld [vmem:[#allocation4] sm:$0xff]  ;;  %p692_p9 = scmp.ne.s32.totalorder %s1522_s29, 1 }
  0x8e   : > { %v383_v9 = vstv %s690_s28  ;;  %713 = vmatpush3.msra.mxu1 %v419_v21 }
  0x8f   : > { %v384_v10 = vadd.s32 %v383_v9, %v382_v8 }
  0x90   : > { %708 = vmatmul.mubr.f32.vlgmr.msra.gmra.mxu0 %v307_v6 }
  0x91   : > { %vm385_vm2 = vcmp.lt.s32.totalorder %v384_v10, 24 }
 0x150   : > { %v376_v11 = vpop.f32.mrf.mxu0 }
 0x151   : > { %v386_v12 = vsel %vm385_vm2, %v376_v11, -1e+30 }
 0x152   : > { %v709_v13 = vpop.f32.mrf.mxu0  ;;  %v389_v14 = vsel %vm388_vm3, %v386_v12, -inf }
 0x153   : > { %390 = vmax.xlane.f32.xlu0 %v389_v14 }
 0x1dc   : > { %v391_v17 = vpop.xlane.xlu0 %390 }
 0x1dd   : > { %v392_v18 = vmax.f32 %v387_v16, %v391_v17 }
 0x1df   : > { %v393_v19 = vsub.f32 %v387_v16, %v392_v18  ;;  %496 = vst.msk [vmem:[#allocation2] sm:$0xff] %vm410_vm4, %v392_v18  ;;  %398 = vperm.xlu0 %855, %v392_v18  }
 0x1e1   : > { %v394_v26 = vmul.f32 1.442695, %v393_v19 }
 0x25a   : > { %v399_v22 = vpop.permute.xlu0 %398 }
 0x25b   : > { %v401_v23 = vsub.f32 %v386_v12, %v399_v22 }
 0x25d   : > { %v402_v24 = vmul.f32 1.442695, %v401_v23 }
 0x25f   : > { %857 = vpow2.f32 %v402_v24 }
 0x260   : > { %859 = vpow2.f32 %v394_v26 }
 0x26c   : > { %v858_v25 = vpop.eup %857 }
 0x26d   : > { %715 = vmatmul.mubr.msk.f32.vlgmr.msra.gmra.mxu1 %vm388_vm3, %v858_v25  ;;  %v406_v27 = vsel %vm388_vm3, %v858_v25, 0.0  ;;  %v860_v28 = vpop.eup %859 }
 0x26e   : > { %407 = vadd.xlane.f32.xlu1 %v406_v27  ;;  %v405_v30 = vmul.f32 %v860_v28, %v404_v29 }
 0x27f   : > { %415 = vperm.xlu1 %856, %v860_v28  }
 0x2f7   : > { %v408_v31 = vpop.xlane.xlu1 %407 }
 0x2f8   : > { %v409_v32 = vadd.f32 %v408_v31, %v405_v30 }
 0x2fa   : > { %411 = vst.msk [vmem:[#allocation3] sm:$0xff] %vm410_vm4, %v409_v32 }
 0x2fb   : > { %v416_v34 = vpop.permute.xlu1 %415 }
 0x2fc   : > { %v418_v35 = vmul.f32 %v416_v34, %v412_v33 }
 0x32c   : > { %500 = sbr.rel (%p692_p9) target bundleno = 965 (0x3c5), region = 52 }
 0x32d   : > { %v490_v36 = vpop.f32.mrf.mxu1 }
 0x32e   : > { %v494_v37 = vadd.f32 %v490_v36, %v418_v35 }
 0x32f   : > { %v716_v38 = vpop.f32.mrf.mxu1 }
 0x330   : > { %495 = vst [vmem:[#allocation4] sm:$0xff] %v494_v37 }
 0x331   : > { %v501_v39 = vld [vmem:[#allocation3] sm:$0xff]  ;;  %v1100_v40 = vmov 0  }
 0x332   : > { %861 = vset.pattern.permute.xlu0 %v1100_v40  ;;  %862 = vrcp.f32 %v501_v39 }
 0x337   : > { %v506_v45 = vld [vmem:[#allocation4] sm:$0xff] }
 0x33f   : > { %v863_v41 = vpop.eup %862 }
 0x340   : > { %v503_v42 = vmul.f32 %v863_v41, %v501_v39 }
 0x342   : > { %v504_v43 = vsub.f32 2.0, %v503_v42 }
 0x344   : > { %v505_v44 = vmul.f32 %v863_v41, %v504_v43 }
 0x346   : > { %509 = vperm.xlu0 %861, %v505_v44  }
 0x3c1   : > { %v510_v46 = vpop.permute.xlu0 %509 }
 0x3c2   : > { %v512_v47 = vmul.f32 %v510_v46, %v506_v45 }
 0x3c4   : > { %513 = vst [vmem:[%s1376_s26] sm:$0xff] %v512_v47 }
 0x3c5 PF: > { %s1523_s21 = sld [smem:[#allocation18_spill]]  ;;  %s530_s1 = sshll.u32 %s1376_s26, 4  ;;  %s531_s1 = int_to_ptr.vmem [resolvable:$true] %s530_s1 }
 0x3c6   : > { %s1524_s23 = sld [smem:[#allocation17_spill]]  ;;  %s515_s7 = scalar_lea.sflag [#allocation7], %s1358_s5 }
 0x3c7   : > { %s1525_s25 = sld [smem:[#allocation27_spill]]  ;;  %s948_s12 = scalar_lea.vmem %s531_s1, 128 }
 0x3c8   : > { %s1526_s19 = sld [smem:[#allocation30_spill]]  ;;  %p949_p4 = scmp.ne.s32.totalorder %s531_s1, %s948_s12 }
 0x3c9   : > { %s1101_s30 = smov [#allocation11]  }
 0x3ca   : > { %s952_s13 = sshll.u32 %s1101_s30, 4  ;;  %s953_s13 = int_to_ptr.vmem [resolvable:$false] %s952_s13 }
 0x3cb   : > { %s718_s4 = smul.u32 3, %s1523_s21  ;;  %s954_s2 = scalar_lea.vmem %s953_s13, 256 }
 0x3cc   : > { %p955_p11 = scmp.lt.s32.totalorder %s531_s1, %s953_s13  ;;  %p956_p7 = scmp.lt.s32.totalorder %s954_s2, %s948_s12 }
 0x3cd   : > { %s526_s20 = sadd.s32 %s1524_s23, %s718_s4  ;;  %p1528_p8 = scmp.ne.s32.totalorder %s1525_s25, 0 }
 0x3ce   : > { %s694_s11 = sshll.u32 %s526_s20, 7  ;;  %s1527_s8 = smov %s1526_s19 }
 0x3cf   : > { %s528_s6 = scalar_lea.hbm %s1526_s19, %s694_s11  ;;  %p950_p10 = pnand %p949_p4, %p1528_p8 }
 0x3d0   : > { %p957_p12 = por %p956_p7, %p955_p11 }
 0x3d1   : > { %p951_p2 = pneg %p950_p10 }
 0x3d3   : > { %p958_p0 = pnand %p957_p12, %p951_p2 }
 0x3d5   : > { %961 = shalt.err (!%p958_p0)
}
 0x3d6   : > { %s962_s26 = scalar_lea.hbm %s528_s6, 128  ;;  %s966_s28 = scalar_lea.hbm %s1527_s8, 768 }
 0x3d7   : > { %p963_p3 = scmp.ne.s32.totalorder %s528_s6, %s962_s26  ;;  %p967_p13 = scmp.lt.s32.totalorder %s528_s6, %s1527_s8 }
 0x3d8   : > { %p968_p6 = scmp.lt.s32.totalorder %s966_s28, %s962_s26 }
 0x3d9   : > { %p964_p1 = pnand %p963_p3, %p1528_p8 }
 0x3da   : > { %p969_p9 = por %p968_p6, %p967_p13 }
 0x3db   : > { %p965_p5 = pneg %p964_p1 }
 0x3dd   : > { %p970_p4 = pnand %p969_p9, %p965_p5 }
 0x3df   : > { %973 = shalt.err (!%p970_p4)
}
 0x3e0   : > { %725 = dma.vmem_to_hbm [thread:$0]  (%p1528_p8), %s531_s1, 128, %s528_s6, %s515_s7  }
 0x3e1 PF: > { %p742_p10 = scmp.ge.s32.totalorder %s1088_s24, 2  ;;  %s542_s4 = sand.u32 1, %s1052_s15  }
 0x3e2   : > { %p1529_p2 = scmp.ne.s32.totalorder %s1510_s18, 0  ;;  %s543_s20 = scalar_lea.sflag [#allocation7], %s542_s4 }
 0x3e4   : > { %p738_p11 = pnand %p742_p10, %p1529_p2 }
 0x3e6   : > { %p739_p7 = pneg %p738_p11 }
 0x3e8   : > { %1035 = dma.done.wait (%p739_p7), %s543_s20, 128  }
 0x3e9   : > { %1037 = vsyncadd (%p739_p7), %s543_s20, 4294967168  ;;  %s22_s24 = sadd.s32 1, %s1088_s24   ;;  %s1531_s12 = sld [smem:[#allocation15_spill]] }
 0x3ea   : > { %p1415_p12 = scmp.ge.s32.totalorder %s22_s24, 14   ;;  %s1532_s18 = sld [smem:[#allocation19_spill]] }
 0x3eb   : > { %s1533_s20 = sld [smem:[#allocation20_spill]]  ;;  %s1537_s13 = smov %s1048_s14 }
 0x3ec   : > { %s1534_s21 = sld [smem:[#allocation21_spill]]  ;;  %s1538_s14 = smov %s1322_s9 }
 0x3ed   : > { %s1535_s25 = sld [smem:[#allocation23_spill]]  ;;  %s1539_s15 = smov %s1056_s16 }
 0x3ee   : > { %s1536_s23 = sld [smem:[#allocation26_spill]]  ;;  %s1540_s16 = smov %s1060_s17 }
 0x3ef   : > { %s1541_s17 = smov %s1317_s3  ;;  %s1542_s19 = smov %s1080_s22 }
 0x3f0   :  { %21 = sbr.rel (!%p1415_p12) target bundleno = 16 (0x10), region = 109 }
 0x3f3   : > { %s1543_s22 = smov %s1535_s25 }
 0x3f5   :  { %548 = vsyncpa [#allocation6], 1 }
 0x3f6   :  { %550 = vsyncpa [#allocation6 + $0x1], 1 }
 0x3f7   :  { %551 = vsyncpa [#allocation9], 1 }
 0x3f8   :  { %553 = vsyncpa [#allocation9 + $0x1], 1 }
 0x3f9   :  { %554 = vsyncpa [#allocation7], 1 }
 0x3fa   :  { %556 = vsyncpa [#allocation7 + $0x1], 1 }

</bundles_post_ra>
